<compile_context>
chip_gen: v7x
topology: tpu7x:2x2x1
jax: 0.10.0
libtpu: 0.0.40
codegen_flags: <defaults>
</compile_context>

<pallas_src>
import jax
import jax.numpy as jnp
from jax import lax
from jax.experimental import pallas as pl
from jax.experimental.pallas import tpu as pltpu

LANE = 128
MAX_TILE_R = 1024  # (1024, 128) f32 block = 512 KiB; double-buffered x2 inputs = 2 MiB


def _make_focal_kernel(gamma: float, n_valid: int, tile_r: int, nblocks: int,
                       needs_mask: bool):
    """Kernel closed over static gamma, valid-element count and tiling info."""
    block_elems = tile_r * LANE

    def _focal_elems(x, t):
        # softplus(-x) = max(-x, 0) + log1p(exp(-|x|))
        #   == max_val + log(exp(-max_val) + exp(-x - max_val))   (PyTorch form)
        sp_negx = jnp.maximum(-x, 0.0) + jnp.log1p(jnp.exp(-jnp.abs(x)))
        loss = x - x * t + sp_negx
        # logsigmoid(z) = -softplus(-z),  z = -x * (2t - 1)
        z = -x * (t * 2.0 - 1.0)
        invprobs = -(jnp.maximum(-z, 0.0) + jnp.log1p(jnp.exp(-jnp.abs(z))))
        return jnp.exp(invprobs * gamma) * loss

    def kernel(x_ref, t_ref, out_ref):
        focal = _focal_elems(x_ref[...], t_ref[...])

        if not needs_mask:
            # Every block is fully valid: no iota/compare/select in the hot path.
            out_ref[0, 0] = jnp.sum(focal)
        else:
            i = pl.program_id(0)
            last = nblocks - 1

            @pl.when(i < last)
            def _():
                out_ref[0, 0] = jnp.sum(focal)

            @pl.when(i == last)
            def _():
                # Only the (possibly ragged / padded) last block is masked.
                row = lax.broadcasted_iota(jnp.int32, (tile_r, LANE), 0)
                col = lax.broadcasted_iota(jnp.int32, (tile_r, LANE), 1)
                flat = last * block_elems + row * LANE + col
                out_ref[0, 0] = jnp.sum(jnp.where(flat < n_valid, focal, 0.0))

    return kernel


def focal_loss(inputs, targets, gamma: float = 2.0):
    """Pallas implementation of FocalLoss.forward (returns a scalar mean)."""
    if inputs.shape != targets.shape:
        raise ValueError(
            "Target size ({}) must be the same as input size ({})".format(
                targets.shape, inputs.shape))

    n = int(inputs.size)
    if n == 0:
        return jnp.float32(float("nan"))  # torch .mean() of an empty tensor

    x = inputs.reshape(-1)
    t = targets.reshape(-1)
    if x.dtype != jnp.float32:
        x = x.astype(jnp.float32)
    if t.dtype != jnp.float32:
        t = t.astype(jnp.float32)

    # Pad only when the flat length is not lane-aligned (rare for NCHW maps).
    rem = n % LANE
    if rem:
        x = jnp.pad(x, (0, LANE - rem))
        t = jnp.pad(t, (0, LANE - rem))
    rows = (n + LANE - 1) // LANE
    x2 = x.reshape(rows, LANE)
    t2 = t.reshape(rows, LANE)

    # Big row-blocks; a single full-height block for small inputs.
    tile_r = rows if rows <= MAX_TILE_R else MAX_TILE_R
    nblocks = pl.cdiv(rows, tile_r)
    needs_mask = (n != nblocks * tile_r * LANE)

    partials = pl.pallas_call(
        _make_focal_kernel(float(gamma), n, tile_r, nblocks, needs_mask),
        out_shape=jax.ShapeDtypeStruct((nblocks, 1), jnp.float32),
        grid_spec=pltpu.PrefetchScalarGridSpec(
            num_scalar_prefetch=0,
            grid=(nblocks,),
            in_specs=[
                pl.BlockSpec((tile_r, LANE), lambda i: (i, 0)),
                pl.BlockSpec((tile_r, LANE), lambda i: (i, 0)),
            ],
            out_specs=pl.BlockSpec((1, 1), lambda i: (i, 0),
                                   memory_space=pltpu.SMEM),
        ),
        compiler_params=pltpu.CompilerParams(
            dimension_semantics=("parallel",)),
        cost_estimate=pl.CostEstimate(
            flops=15 * n,
            transcendentals=5 * n,
            bytes_accessed=8 * n + 4 * nblocks),
    )(x2, t2)

    return jnp.sum(partials) / jnp.float32(n)


def focal_loss_ref(inputs, targets, gamma: float = 2.0):
    """Pure-JAX reference mirroring the PyTorch forward exactly."""
    x = inputs.astype(jnp.float32)
    t = targets.astype(jnp.float32)
    max_val = jnp.maximum(-x, 0.0)
    loss = x - x * t + max_val + jnp.log(
        jnp.exp(-max_val) + jnp.exp(-x - max_val))
    z = -x * (t * 2.0 - 1.0)
    m = jnp.maximum(-z, 0.0)
    invprobs = -(m + jnp.log(jnp.exp(-m) + jnp.exp(-z - m)))
    return jnp.mean(jnp.exp(invprobs * gamma) * loss)


if __name__ == "__main__":
    key = jax.random.PRNGKey(0)

    # Spec shape + a ragged shape (pad/mask path) + a multi-block shape
    # (exercises the 1024-row tiles and the parallel grid).
    shapes = [(2, 4, 16, 16), (2, 3, 17, 13), (8, 8, 64, 64)]
    for idx, shp in enumerate(shapes):
        k1, k2 = jax.random.split(jax.random.fold_in(key, idx))
        x = jax.random.normal(k1, shp, dtype=jnp.float32) * 2.0
        t = (jax.random.uniform(k2, shp) > 0.5).astype(jnp.float32)

        out = jax.block_until_ready(focal_loss(x, t, gamma=2.0))
        ref = focal_loss_ref(x, t, gamma=2.0)
        assert jnp.allclose(out, ref, rtol=1e-5, atol=1e-5), (shp, out, ref)

    print("KERNEL_OK")
</pallas_src>

<mosaic_0001>
module attributes {stable_mosaic.version = 11 : i64} {
  func.func @kernel(%arg0: i32, %arg1: memref<16x128xf32, #tpu.memory_space<vmem>>, %arg2: memref<16x128xf32, #tpu.memory_space<vmem>>, %arg3: memref<1x1xf32, #tpu.memory_space<smem>>) attributes {dimension_semantics = [#tpu.dimension_semantics<parallel>], iteration_bounds = array<i64: 1>, scalar_prefetch = 0 : i64, scratch_operands = 0 : i64, tpu.core_type = #tpu.core_type<tc>, window_params = [{transform_indices = @transform_0, window_bounds = array<i64: 16, 128>}, {transform_indices = @transform_1, window_bounds = array<i64: 16, 128>}, {transform_indices = @transform_2, window_bounds = array<i64: 1, 1>}]} {
    %c0 = arith.constant 0 : index
    %c0_0 = arith.constant 0 : index
    %0 = vector.load %arg1[%c0, %c0_0] : memref<16x128xf32, #tpu.memory_space<vmem>>, vector<16x128xf32>
    %c0_1 = arith.constant 0 : index
    %c0_2 = arith.constant 0 : index
    %1 = vector.load %arg2[%c0_1, %c0_2] : memref<16x128xf32, #tpu.memory_space<vmem>>, vector<16x128xf32>
    %cst = arith.constant 0.000000e+00 : f32
    %2 = vector.broadcast %cst : f32 to vector<16x128xf32>
    %3 = arith.subf %2, %0 : vector<16x128xf32>
    %cst_3 = arith.constant 0.000000e+00 : f32
    %4 = vector.broadcast %cst_3 : f32 to vector<16x128xf32>
    %5 = arith.maximumf %3, %4 : vector<16x128xf32>
    %6 = math.absf %0 : vector<16x128xf32>
    %cst_4 = arith.constant 0.000000e+00 : f32
    %7 = vector.broadcast %cst_4 : f32 to vector<16x128xf32>
    %8 = arith.subf %7, %6 : vector<16x128xf32>
    %9 = math.exp %8 : vector<16x128xf32>
    %10 = math.log1p %9 : vector<16x128xf32>
    %11 = arith.addf %5, %10 : vector<16x128xf32>
    %12 = arith.mulf %0, %1 : vector<16x128xf32>
    %13 = arith.subf %0, %12 : vector<16x128xf32>
    %14 = arith.addf %13, %11 : vector<16x128xf32>
    %cst_5 = arith.constant 0.000000e+00 : f32
    %15 = vector.broadcast %cst_5 : f32 to vector<16x128xf32>
    %16 = arith.subf %15, %0 : vector<16x128xf32>
    %cst_6 = arith.constant 2.000000e+00 : f32
    %17 = vector.broadcast %cst_6 : f32 to vector<16x128xf32>
    %18 = arith.mulf %1, %17 : vector<16x128xf32>
    %cst_7 = arith.constant 1.000000e+00 : f32
    %19 = vector.broadcast %cst_7 : f32 to vector<16x128xf32>
    %20 = arith.subf %18, %19 : vector<16x128xf32>
    %21 = arith.mulf %16, %20 : vector<16x128xf32>
    %cst_8 = arith.constant 0.000000e+00 : f32
    %22 = vector.broadcast %cst_8 : f32 to vector<16x128xf32>
    %23 = arith.subf %22, %21 : vector<16x128xf32>
    %cst_9 = arith.constant 0.000000e+00 : f32
    %24 = vector.broadcast %cst_9 : f32 to vector<16x128xf32>
    %25 = arith.maximumf %23, %24 : vector<16x128xf32>
    %26 = math.absf %21 : vector<16x128xf32>
    %cst_10 = arith.constant 0.000000e+00 : f32
    %27 = vector.broadcast %cst_10 : f32 to vector<16x128xf32>
    %28 = arith.subf %27, %26 : vector<16x128xf32>
    %29 = math.exp %28 : vector<16x128xf32>
    %30 = math.log1p %29 : vector<16x128xf32>
    %31 = arith.addf %25, %30 : vector<16x128xf32>
    %cst_11 = arith.constant 0.000000e+00 : f32
    %32 = vector.broadcast %cst_11 : f32 to vector<16x128xf32>
    %33 = arith.subf %32, %31 : vector<16x128xf32>
    %cst_12 = arith.constant 2.000000e+00 : f32
    %34 = vector.broadcast %cst_12 : f32 to vector<16x128xf32>
    %35 = arith.mulf %33, %34 : vector<16x128xf32>
    %36 = math.exp %35 : vector<16x128xf32>
    %37 = arith.mulf %36, %14 : vector<16x128xf32>
    %38 = vector.shape_cast %37 : vector<16x128xf32> to vector<1x16x128xf32>
    %cst_13 = arith.constant dense<0.000000e+00> : vector<1xf32>
    %39 = vector.multi_reduction <add>, %38, %cst_13 [1, 2] : vector<1x16x128xf32> to vector<1xf32>
    %40 = vector.shape_cast %39 : vector<1xf32> to vector<1x1x1xf32>
    %41 = vector.extract %40[0, 0, 0] : f32 from vector<1x1x1xf32>
    %c0_14 = arith.constant 0 : index
    %c0_15 = arith.constant 0 : index
    %42 = memref.load %arg3[%c0_14, %c0_15] : memref<1x1xf32, #tpu.memory_space<smem>>
    memref.store %41, %arg3[%c0_14, %c0_15] : memref<1x1xf32, #tpu.memory_space<smem>>
    return
  }
  func.func @transform_0(%arg0: i32) -> (i32, i32) {
    %c0_i32 = arith.constant 0 : i32
    %c0_i32_0 = arith.constant 0 : i32
    return %arg0, %c0_i32 : i32, i32
  }
  func.func @transform_1(%arg0: i32) -> (i32, i32) {
    %c0_i32 = arith.constant 0 : i32
    %c0_i32_0 = arith.constant 0 : i32
    return %arg0, %c0_i32 : i32, i32
  }
  func.func @transform_2(%arg0: i32) -> (i32, i32) {
    %c0_i32 = arith.constant 0 : i32
    %c0_i32_0 = arith.constant 0 : i32
    return %arg0, %c0_i32 : i32, i32
  }
}

</mosaic_0001>

<bundles_post_ra>
// kernel: tpu_custom_call.1
= control target key start
LH: loop header
LB: loop body
LE: loop exit
PB: predicated region body
PF: predicated region fallthrough
CT: control target
= control target key end

     0   :  { %7 = vsyncpa [#allocation3], 0  ;;  %s330_s0 = inlined_call_operand.hbm [shape: f32[16,128], index: 0, kind: input, shape index: {}]   ;;  %s331_s1 = inlined_call_operand.hbm [shape: f32[16,128], index: 1, kind: input, shape index: {}]   ;;  %s332_s2 = inlined_call_operand.hbm [shape: f32[1,1], index: 2, kind: output, shape index: {}]  }
   0x1   :  { %8 = vsyncpa [#allocation6], 0 }
   0x2   :  { %9 = vsyncpa [#allocation4], 0  ;;  %s246_s9 = smov [#allocation2]   ;;  %s186_s13 = scalar_lea.hbm %s330_s0, 256 }
   0x3   :  { %s15_s10 = sshll.u32 %s246_s9, 4  ;;  %p187_p0 = scmp.ne.s32.totalorder %s330_s0, %s186_s13  ;;  %s16_s10 = int_to_ptr.vmem [resolvable:$true] %s15_s10 }
   0x4   :  { %p190_p1 = scmp.lt.u32.totalorder %s186_s13, %s330_s0 }
   0x6   :  { %p192_p2 = pnand %p190_p1, %p187_p0 }
   0x8   :  { %195 = shalt.err (!%p192_p2)
}
   0x9   :  { %s196_s18 = scalar_lea.vmem %s16_s10, 256  ;;  %p201_p4 = scmp.lt.s32.totalorder %s16_s10, %s16_s10 }
   0xa   :  { %p197_p3 = scmp.ne.s32.totalorder %s16_s10, %s196_s18  ;;  %p202_p5 = scmp.lt.s32.totalorder %s196_s18, %s196_s18 }
   0xc   :  { %p203_p6 = por %p202_p5, %p201_p4 }
   0xe   :  { %p204_p7 = pnand %p203_p6, %p197_p3 }
  0x10   :  { %207 = shalt.err (!%p204_p7)
}
  0x11   :  { %s247_s19 = smov 128   ;;  %s248_s20 = smov 8  }
  0x12   :  { %21 = dma.hbm_to_vmem [thread:$0]  %s330_s0, 256, %s16_s10, [#allocation3], %s247_s19, %s247_s19, %s248_s20  }
  0x13   :  { %s249_s23 = smov [#allocation5]   ;;  %s208_s27 = scalar_lea.hbm %s331_s1, 256 }
  0x14   :  { %s27_s24 = sshll.u32 %s249_s23, 4  ;;  %p209_p8 = scmp.ne.s32.totalorder %s331_s1, %s208_s27  ;;  %s28_s24 = int_to_ptr.vmem [resolvable:$true] %s27_s24 }
  0x15   :  { %p212_p9 = scmp.lt.u32.totalorder %s208_s27, %s331_s1 }
  0x17   :  { %p214_p10 = pnand %p212_p9, %p209_p8 }
  0x19   :  { %217 = shalt.err (!%p214_p10)
}
  0x1a   :  { %s218_s4 = scalar_lea.vmem %s28_s24, 256  ;;  %p223_p12 = scmp.lt.s32.totalorder %s28_s24, %s28_s24 }
  0x1b   :  { %p219_p11 = scmp.ne.s32.totalorder %s28_s24, %s218_s4  ;;  %p224_p13 = scmp.lt.s32.totalorder %s218_s4, %s218_s4 }
  0x1d   :  { %p225_p0 = por %p224_p13, %p223_p12 }
  0x1f   :  { %p226_p1 = pnand %p225_p0, %p219_p11 }
  0x21   :  { %229 = shalt.err (!%p226_p1)
}
  0x22   :  { %33 = dma.hbm_to_vmem [thread:$0]  %s331_s1, 256, %s28_s24, [#allocation6], %s247_s19, %s247_s19, %s248_s20  }
  0x23   :  { %240 = dma.done.wait [#allocation3], 256  }
  0x24   :  { %241 = vsyncadd [#allocation3], 4294967040 }
  0x25   :  { %242 = dma.done.wait [#allocation6], 256  }
  0x26   :  { %243 = vsyncadd [#allocation6], 4294967040  ;;  %v290_v0 = vld [vmem:[#allocation2] sm:$0xff]  ;;  %v292_v1 = vld [vmem:[#allocation2 + $0x8] sm:$0xff]  ;;  %s230_s8 = scalar_lea.hbm %s332_s2, 16 }
  0x27   :  { %v294_v2 = vld [vmem:[#allocation5] sm:$0xff]  ;;  %v296_v3 = vld [vmem:[#allocation5 + $0x8] sm:$0xff]  ;;  %v48_v4 = vand.u32 2147483647, %v290_v0  ;;  %v44_v5 = vsub.f32 0.0, %v290_v0  ;;  %v45_v6 = vsub.f32 0.0, %v292_v1  ;;  %p231_p2 = scmp.ne.s32.totalorder %s332_s2, %s230_s8  ;;  %p234_p3 = scmp.lt.u32.totalorder %s230_s8, %s332_s2 }
  0x28   :  { %v82_v7 = vmul.f32 2.0, %v294_v2  ;;  %v83_v8 = vmul.f32 2.0, %v296_v3  ;;  %v49_v9 = vand.u32 2147483647, %v292_v1 }
  0x29   :  { %v50_v12 = vsub.f32 0.0, %v48_v4  ;;  %p236_p4 = pnand %p234_p3, %p231_p2 }
  0x2a   :  { %v157_v10 = vadd.f32 -1.0, %v82_v7  ;;  %v158_v11 = vadd.f32 -1.0, %v83_v8  ;;  %v51_v15 = vsub.f32 0.0, %v49_v9 }
  0x2b   :  { %v52_v17 = vmul.f32 1.442695, %v50_v12  ;;  %v76_v12 = vmul.f32 %v294_v2, %v290_v0 }
  0x2c   :  { %v86_v13 = vmul.f32 %v157_v10, %v44_v5  ;;  %v87_v14 = vmul.f32 %v158_v11, %v45_v6  ;;  %v54_v21 = vmul.f32 1.442695, %v51_v15  ;;  %v46_v11 = vmax.f32 %v44_v5, 0.0 }
  0x2d   :  { %166 = vpow2.f32 %v52_v17 }
  0x2e   :  { %v92_v16 = vand.u32 2147483647, %v86_v13  ;;  %v93_v18 = vand.u32 2147483647, %v87_v14  ;;  %v88_v35 = vsub.f32 0.0, %v86_v13  ;;  %v89_v38 = vsub.f32 0.0, %v87_v14 }
  0x2f   :  { %v47_v14 = vmax.f32 %v45_v6, 0.0 }
  0x30   :  { %v94_v19 = vsub.f32 0.0, %v92_v16  ;;  %v95_v20 = vsub.f32 0.0, %v93_v18  ;;  %v90_v43 = vmax.f32 %v88_v35, 0.0  ;;  %v91_v47 = vmax.f32 %v89_v38, 0.0 }
  0x31   :  { %v77_v16 = vmul.f32 %v296_v3, %v292_v1 }
  0x32   :  { %v96_v22 = vmul.f32 1.442695, %v94_v19  ;;  %v98_v23 = vmul.f32 1.442695, %v95_v20  ;;  %v78_v19 = vsub.f32 %v290_v0, %v76_v12 }
  0x33   :  { %v79_v5 = vsub.f32 %v292_v1, %v77_v16 }
  0x34   :  { %168 = vpow2.f32 %v96_v22 }
  0x35   :  { %170 = vpow2.f32 %v98_v23 }
  0x36   :  { %172 = vpow2.f32 %v54_v21 }
  0x37   :  { %v167_v24 = vpop.eup %166 }
  0x38   :  { %v56_v30 = vadd.f32 1.0, %v167_v24  ;;  %v59_v42 = vmul.f32 -0.5, %v167_v24  ;;  %v62_v55 = vand.u32 2147483647, %v167_v24 }
  0x3a   :  { %v60_v51 = vadd.f32 1.0, %v59_v42  ;;  %vm63_vm2 = vcmp.lt.f32.partialorder %v62_v55, 0.0004427343 }
  0x3c   :  { %v61_v63 = vmul.f32 %v167_v24, %v60_v51 }
  0x3e   :  { %v169_v25 = vpop.eup %168 }
  0x3f   :  { %v171_v26 = vpop.eup %170  ;;  %v100_v27 = vadd.f32 1.0, %v169_v25  ;;  %v103_v31 = vmul.f32 -0.5, %v169_v25  ;;  %v106_v36 = vand.u32 2147483647, %v169_v25 }
  0x40   :  { %v173_v28 = vpop.eup %172  ;;  %v109_v29 = vadd.f32 1.0, %v171_v26  ;;  %v112_v33 = vmul.f32 -0.5, %v171_v26  ;;  %v115_v39 = vand.u32 2147483647, %v171_v26 }
  0x41   :  { %174 = vlog2.f32 %v100_v27  ;;  %v65_v32 = vadd.f32 1.0, %v173_v28  ;;  %v104_v34 = vadd.f32 1.0, %v103_v31  ;;  %vm107_vm0 = vcmp.lt.f32.partialorder %v106_v36, 0.0004427343 }
  0x42   :  { %176 = vlog2.f32 %v109_v29  ;;  %v113_v37 = vadd.f32 1.0, %v112_v33  ;;  %v68_v46 = vmul.f32 -0.5, %v173_v28  ;;  %vm116_vm1 = vcmp.lt.f32.partialorder %v115_v39, 0.0004427343 }
  0x43   :  { %178 = vlog2.f32 %v56_v30  ;;  %v105_v40 = vmul.f32 %v169_v25, %v104_v34  ;;  %v71_v59 = vand.u32 2147483647, %v173_v28 }
  0x44   :  { %180 = vlog2.f32 %v65_v32  ;;  %v114_v44 = vmul.f32 %v171_v26, %v113_v37  ;;  %v69_v56 = vadd.f32 1.0, %v68_v46 }
  0x45   :  { %vm72_vm3 = vcmp.lt.f32.partialorder %v71_v59, 0.0004427343 }
  0x46   :  { %v70_v8 = vmul.f32 %v173_v28, %v69_v56 }
  0x4b   :  { %v175_v41 = vpop.eup %174 }
  0x4c   :  { %v177_v45 = vpop.eup %176  ;;  %v102_v48 = vmul.f32 0.6931472, %v175_v41 }
  0x4d   :  { %v111_v49 = vmul.f32 0.6931472, %v177_v45  ;;  %v179_v54 = vpop.eup %178 }
  0x4e   :  { %v108_v50 = vsel %vm107_vm0, %v105_v40, %v102_v48  ;;  %v181_v58 = vpop.eup %180  ;;  %v58_v62 = vmul.f32 0.6931472, %v179_v54 }
  0x4f   :  { %v117_v52 = vsel %vm116_vm1, %v114_v44, %v111_v49  ;;  %v118_v53 = vadd.f32 %v108_v50, %v90_v43  ;;  %v67_v7 = vmul.f32 0.6931472, %v181_v58 }
  0x50   :  { %v119_v57 = vadd.f32 %v117_v52, %v91_v47  ;;  %v64_v15 = vsel %vm63_vm2, %v61_v63, %v58_v62 }
  0x51   :  { %v120_v60 = vsub.f32 0.0, %v118_v53  ;;  %v73_v17 = vsel %vm72_vm3, %v70_v8, %v67_v7  ;;  %v74_v18 = vadd.f32 %v64_v15, %v46_v11 }
  0x52   :  { %v121_v61 = vsub.f32 0.0, %v119_v57  ;;  %v75_v20 = vadd.f32 %v73_v17, %v47_v14 }
  0x53   :  { %v122_v4 = vmul.f32 2.0, %v120_v60  ;;  %v80_v21 = vadd.f32 %v78_v19, %v74_v18 }
  0x54   :  { %v123_v9 = vmul.f32 2.0, %v121_v61  ;;  %v81_v22 = vadd.f32 %v79_v5, %v75_v20 }
  0x55   :  { %v124_v10 = vmul.f32 1.442695, %v122_v4 }
  0x56   :  { %v126_v13 = vmul.f32 1.442695, %v123_v9 }
  0x57   :  { %182 = vpow2.f32 %v124_v10 }
  0x58   :  { %184 = vpow2.f32 %v126_v13 }
  0x61   :  { %v183_v2 = vpop.eup %182 }
  0x62   :  { %v185_v23 = vpop.eup %184  ;;  %v128_v24 = vmul.f32 %v183_v2, %v80_v21 }
  0x63   :  { %v129_v25 = vmul.f32 %v185_v23, %v81_v22 }
  0x65   :  { %v130_v6 = vadd.f32 %v129_v25, %v128_v24 }
  0x67   :  { %131 = vadd.xlane.f32.xlu0 %v130_v6 }
  0xf4   :  { %v132_v26 = vpop.xlane.xlu0 %131 }
  0xf5   :  { %v133_v27 = vrot.slane %v132_v26, 4 }
  0xf7   :  { %v134_v3 = vadd.f32 %v133_v27, %v132_v26 }
  0xf9   :  { %v135_v28 = vrot.slane %v134_v3, 2 }
  0xfb   :  { %v136_v29 = vadd.f32 %v135_v28, %v134_v3 }
  0xfd   :  { %v137_v30 = vrot.slane %v136_v29, 1 }
  0xff   :  { %v138_v31 = vadd.f32 %v137_v30, %v136_v29 }
 0x101   :  { %159 = vpush %v138_v31 }
 0x132   :  { %s160_s1 = spop %159 }
 0x133   :  { %141 = sst [smem:[#allocation7]] %s160_s1 }
 0x134   :  { %239 = shalt.err (!%p236_p4)
}
 0x135   :  { %s250_s13 = smov [#allocation7]  }
 0x136   :  { %149 = dma.smem_to_hbm %s250_s13, 16, %s332_s2, [#allocation4]  }
 0x137   :  { %244 = dma.done.wait [#allocation4], 16  }
 0x138   :  { %245 = vsyncadd [#allocation4], 4294967280 }
 0x139   :  { %153 = sfence }
 0x13a   :  { %154 = vsyncpa [#allocation3], 1 }
 0x13b   :  { %155 = vsyncpa [#allocation6], 1 }
 0x13c   :  { %156 = vsyncpa [#allocation4], 1 }

</bundles_post_ra>
